<compile_context>
chip_gen: v5e
topology: v5e:2x2
jax: 0.10.0
libtpu: 0.0.40
codegen_flags: <defaults>
</compile_context>

<pallas_src>
import numpy as np
import jax
import jax.numpy as jnp
from jax import lax
from jax.experimental import pallas as pl
from jax.experimental.pallas import tpu as pltpu

SPLIT_TRAIN, SPLIT_DEV, SPLIT_TEST = 0, 1, 2
_SPLIT_MAP = {"train": SPLIT_TRAIN, "dev": SPLIT_DEV, "test": SPLIT_TEST}

_LANE = 128
_SUBLANE = 8
_TB_MAX = 512                       # max examples per grid step
_N_DMA = 8                          # row DMAs kept in flight (HBM gather path)
_DEFAULT_RESIDENT_LIMIT = 16 << 20  # tables above this use the HBM gather path


def _round_up(x, m):
    return ((x + m - 1) // m) * m


def split_codes_from_strings(splits):
    """Map split strings to int codes, raising like the PyTorch module."""
    codes = []
    for s in splits:
        if s not in _SPLIT_MAP:
            raise ValueError(f"Unhandled split {s}")
        codes.append(_SPLIT_MAP[s])
    return jnp.array(codes, dtype=jnp.int32)


# --------------------------------------------------------------------------
# Kernels
# --------------------------------------------------------------------------
def _resident_gather_kernel(rows_ref, table_hbm, out_ref, table_vmem):
    """Gather rows from a single-buffered VMEM-resident copy of the table.

    rows_ref   : SMEM (B_pad,) int32 global row indices (scalar prefetch)
    table_hbm  : ANY  (N, D_pad) f32 concatenated table (stays in HBM)
    out_ref    : VMEM (TB, D_pad) f32 output block for this grid step
    table_vmem : VMEM (N, D_pad) f32 scratch -- resident copy, loaded once
    """
    # One-shot HBM->VMEM copy of the whole table.  The scratch persists across
    # grid steps (grid axis is "arbitrary" => single core, sequential).
    @pl.when(pl.program_id(0) == 0)
    def _():
        pltpu.sync_copy(table_hbm, table_vmem)

    tb = out_ref.shape[0]
    base = pl.program_id(0) * tb
    n_groups = tb // _SUBLANE

    def body(g, carry):
        r0 = base + g * _SUBLANE
        # Pack 8 gathered rows into one (8, D_pad) sublane-dense block and
        # issue a single unmasked store instead of 8 masked 1-sublane stores.
        rows = [table_vmem[pl.ds(rows_ref[r0 + j], 1), :]
                for j in range(_SUBLANE)]
        blk = jnp.concatenate(rows, axis=0)
        start = pl.multiple_of(g * _SUBLANE, _SUBLANE)
        out_ref[pl.ds(start, _SUBLANE), :] = blk
        return carry

    lax.fori_loop(0, n_groups, body, None, unroll=min(8, n_groups))


def _hbm_gather_kernel(rows_ref, table_hbm, out_ref, sem):
    """Gather rows straight from HBM; up to _N_DMA row-DMAs in flight.

    rows_ref  : SMEM (B_pad,) int32 global row indices (scalar prefetch)
    table_hbm : ANY  (N, D_pad) f32 concatenated table (stays in HBM)
    out_ref   : VMEM (TB, D_pad) f32 output block (DMA destination)
    sem       : DMA semaphores, shape (_N_DMA,)
    """
    tb = out_ref.shape[0]
    base = pl.program_id(0) * tb
    ndma = min(_N_DMA, tb)

    def start(r):
        row = rows_ref[base + r]
        pltpu.make_async_copy(
            table_hbm.at[pl.ds(row, 1), :],
            out_ref.at[pl.ds(r, 1), :],
            sem.at[r % ndma],
        ).start()

    # Prime the pipeline with ndma outstanding row copies.
    for j in range(ndma):
        start(j)

    @pl.loop(0, tb)
    def _(r):
        # Wait for row r's DMA, then reuse its (now free) slot for row r+ndma.
        pltpu.make_async_copy(
            table_hbm.at[pl.ds(0, 1), :],
            out_ref.at[pl.ds(r, 1), :],
            sem.at[r % ndma],
        ).wait()

        @pl.when(r + ndma < tb)
        def _():
            start(r + ndma)


# --------------------------------------------------------------------------
# Module wrapper
# --------------------------------------------------------------------------
class PrecomputedQueryEncoder:
    """Pallas-TPU port of the PyTorch PrecomputedQueryEncoder."""

    def __init__(self, query_enc_train, query_enc_dev, query_enc_test,
                 max_resident_table_bytes=_DEFAULT_RESIDENT_LIMIT):
        enc = [jnp.asarray(t, dtype=jnp.float32)
               for t in (query_enc_train, query_enc_dev, query_enc_test)]
        D = enc[0].shape[1]
        assert all(t.shape[1] == D for t in enc), "embedding dims must match"
        self._dim = D
        self._dim_pad = _round_up(D, _LANE)   # lane-dense output layout
        if self._dim_pad != D:
            enc = [jnp.pad(t, ((0, 0), (0, self._dim_pad - D))) for t in enc]
        self._sizes = np.array([t.shape[0] for t in enc], dtype=np.int64)
        self._offsets = jnp.array(
            [0, int(self._sizes[0]), int(self._sizes[0] + self._sizes[1])],
            dtype=jnp.int32)
        # Hoisted out of forward(): concatenated exactly once.
        self._table = jnp.concatenate(enc, axis=0)
        self._table_bytes = int(self._table.shape[0]) * self._dim_pad * 4
        # Threshold for the VMEM-resident fast path; lower it on v5e
        # (16 MiB default scoped VMEM, ~820 GB/s HBM) if desired.
        self._max_resident_bytes = int(max_resident_table_bytes)

    # ---- QueryEncoderBase API ----
    def get_query_embedding_dim(self):
        return self._dim

    def is_trainable(self):
        return False

    def save(self, save_path):
        pass

    # ---- validation (mirrors PyTorch error behavior for concrete inputs) ----
    def _validate(self, ex_ids, split_codes):
        try:
            ids = np.asarray(ex_ids)
            codes = np.asarray(split_codes)
        except Exception:
            # TODO(synk): traced inputs cannot be validated eagerly; invalid
            # split codes / ids silently clamp instead of raising.
            return
        if codes.size and (codes.min() < 0 or codes.max() > 2):
            raise ValueError("Unhandled split code (expected 0=train,1=dev,2=test)")
        if ids.size:
            limits = self._sizes[codes]
            if (ids < 0).any() or (ids >= limits).any():
                raise IndexError("example id out of range for its split")

    def __call__(self, ex_ids, split, device=None, **kwargs):
        return self.forward(ex_ids, split, device=device, **kwargs)

    # ---- forward ----
    def forward(self, ex_ids, split, device=None, *, force_hbm_gather=False,
                tb=None, **kwargs):
        """ex_ids: (B,) int ids; split: (B,) int codes or list of split strings."""
        if isinstance(split, (list, tuple)):
            split_codes = split_codes_from_strings(split)
        else:
            split_codes = jnp.asarray(split, dtype=jnp.int32)
        ex_ids = jnp.asarray(ex_ids, dtype=jnp.int32)
        self._validate(ex_ids, split_codes)

        B = int(ex_ids.shape[0])
        D, D_pad = self._dim, self._dim_pad
        if B == 0:
            out = jnp.zeros((0, D), dtype=jnp.float32)
            return jax.device_put(out, device) if device is not None else out

        rows = ex_ids + jnp.take(self._offsets, split_codes)

        if tb is None:
            tb = max(_SUBLANE, min(_TB_MAX, _round_up(B, _SUBLANE)))
        assert tb % _SUBLANE == 0, "tb must be a multiple of 8"
        B_pad = _round_up(B, tb)
        rows_pad = jnp.pad(rows, (0, B_pad - B))   # padded rows gather row 0
        grid = (B_pad // tb,)

        table = self._table
        N = int(table.shape[0])
        out_block_bytes = tb * D_pad * 4
        use_resident = (not force_hbm_gather
                        and self._table_bytes <= self._max_resident_bytes)

        if use_resident:
            table_scratch_bytes = _round_up(N, _SUBLANE) * D_pad * 4
            vmem_limit = min(table_scratch_bytes + 2 * out_block_bytes + (4 << 20),
                             64 << 20)
            out = pl.pallas_call(
                _resident_gather_kernel,
                out_shape=jax.ShapeDtypeStruct((B_pad, D_pad), jnp.float32),
                grid_spec=pltpu.PrefetchScalarGridSpec(
                    num_scalar_prefetch=1,            # rows land in SMEM
                    grid=grid,
                    in_specs=[pl.BlockSpec(memory_space=pl.ANY)],  # table in HBM
                    out_specs=pl.BlockSpec((tb, D_pad),
                                           lambda i, rows_ref: (i, 0)),
                    scratch_shapes=[pltpu.VMEM((N, D_pad), jnp.float32)],
                ),
                compiler_params=pltpu.CompilerParams(
                    # Single core: the scratch table copy at step 0 is reused
                    # by later steps; also avoids duplicating the table per
                    # TensorCore on v7x (64 MiB/TC VMEM).
                    dimension_semantics=("arbitrary",),
                    vmem_limit_bytes=int(vmem_limit),
                ),
                cost_estimate=pl.CostEstimate(
                    flops=0, transcendentals=0,
                    bytes_accessed=int(N * D_pad * 4        # table read once
                                       + B_pad * D_pad * 4  # output write
                                       + B_pad * 4)),       # row indices
            )(rows_pad, table)
        else:
            # Large-table path: table stays in HBM, O(B) per-row DMA gather.
            vmem_limit = min(2 * out_block_bytes + (4 << 20), 64 << 20)
            out = pl.pallas_call(
                _hbm_gather_kernel,
                out_shape=jax.ShapeDtypeStruct((B_pad, D_pad), jnp.float32),
                grid_spec=pltpu.PrefetchScalarGridSpec(
                    num_scalar_prefetch=1,
                    grid=grid,
                    in_specs=[pl.BlockSpec(memory_space=pl.ANY)],
                    out_specs=pl.BlockSpec((tb, D_pad),
                                           lambda i, rows_ref: (i, 0)),
                    scratch_shapes=[pltpu.SemaphoreType.DMA((_N_DMA,))],
                ),
                compiler_params=pltpu.CompilerParams(
                    dimension_semantics=("parallel",),
                    vmem_limit_bytes=int(vmem_limit),
                ),
                cost_estimate=pl.CostEstimate(
                    flops=0, transcendentals=0,
                    bytes_accessed=int(B_pad * D_pad * 4    # gathered rows
                                       + B_pad * D_pad * 4  # output write
                                       + B_pad * 4)),
            )(rows_pad, table)

        if not (B_pad == B and D_pad == D):
            out = out[:B, :D]
        return jax.device_put(out, device) if device is not None else out


# --------------------------------------------------------------------------
# Self-test
# --------------------------------------------------------------------------
if __name__ == "__main__":
    key = jax.random.PRNGKey(0)
    k1, k2, k3, k4, k5 = jax.random.split(key, 5)

    # ---- Test 1: small lane-aligned tables, resident (VMEM scratch) path ----
    D = 128
    N_TRAIN, N_DEV, N_TEST = 16, 12, 10
    enc_train = jax.random.normal(k1, (N_TRAIN, D), dtype=jnp.float32)
    enc_dev = jax.random.normal(k2, (N_DEV, D), dtype=jnp.float32)
    enc_test = jax.random.normal(k3, (N_TEST, D), dtype=jnp.float32)

    encoder = PrecomputedQueryEncoder(enc_train, enc_dev, enc_test)
    assert encoder.get_query_embedding_dim() == D
    assert not encoder.is_trainable()

    splits_str = ["train", "dev", "test", "train", "test", "dev", "train", "dev"]
    ex_ids = jnp.array([3, 7, 9, 15, 0, 11, 4, 2], dtype=jnp.int32)

    out = jax.block_until_ready(encoder.forward(ex_ids, splits_str))

    tables = [enc_train, enc_dev, enc_test]
    codes = [_SPLIT_MAP[s] for s in splits_str]
    ref = jnp.stack([tables[c][int(e)] for e, c in zip(list(ex_ids), codes)])
    assert out.shape == (ex_ids.shape[0], D) and out.dtype == jnp.float32
    assert jnp.allclose(out, ref), "resident-path gather mismatch"

    # ---- Test 2: larger batch, multi-step grid, forced HBM per-row DMA path ----
    B2 = 200
    codes2 = jax.random.randint(k4, (B2,), 0, 3, dtype=jnp.int32)
    sizes = jnp.array([N_TRAIN, N_DEV, N_TEST], dtype=jnp.int32)
    ids2 = jax.random.randint(k5, (B2,), 0, 10_000,
                              dtype=jnp.int32) % jnp.take(sizes, codes2)

    out2 = jax.block_until_ready(
        encoder.forward(ids2, codes2, force_hbm_gather=True, tb=64))

    full = jnp.concatenate(tables, axis=0)
    offs = jnp.array([0, N_TRAIN, N_TRAIN + N_DEV], dtype=jnp.int32)
    ref2 = full[ids2 + jnp.take(offs, codes2)]
    assert out2.shape == (B2, D)
    assert jnp.allclose(out2, ref2), "HBM-gather-path mismatch"

    # ---- Test 3: non-lane-aligned D (padding path), resident ----
    D3 = 96
    e3t = jax.random.normal(k1, (9, D3), dtype=jnp.float32)
    e3d = jax.random.normal(k2, (5, D3), dtype=jnp.float32)
    e3s = jax.random.normal(k3, (7, D3), dtype=jnp.float32)
    enc3 = PrecomputedQueryEncoder(e3t, e3d, e3s)

    ids3 = jnp.array([0, 8, 4, 6, 1, 2, 3, 0, 4, 5], dtype=jnp.int32)
    codes3 = jnp.array([0, 0, 1, 2, 2, 1, 0, 1, 1, 2], dtype=jnp.int32)
    out3 = jax.block_until_ready(enc3.forward(ids3, codes3))

    t3 = [e3t, e3d, e3s]
    ref3 = jnp.stack([t3[int(c)][int(i)]
                      for i, c in zip(list(ids3), list(codes3))])
    assert out3.shape == (10, D3)
    assert jnp.allclose(out3, ref3), "padded-D path mismatch"

    print("KERNEL_OK")
</pallas_src>

<mosaic_0001>
module attributes {stable_mosaic.version = 11 : i64} {
  func.func @_resident_gather_kernel(%arg0: i32, %arg1: memref<8xi32, #tpu.memory_space<smem>>, %arg2: memref<38x128xf32, #tpu.memory_space<any>>, %arg3: memref<8x128xf32, #tpu.memory_space<vmem>>, %arg4: memref<38x128xf32, #tpu.memory_space<vmem>>) attributes {dimension_semantics = [#tpu.dimension_semantics<arbitrary>], iteration_bounds = array<i64: 1>, scalar_prefetch = 1 : i64, scratch_operands = 1 : i64, tpu.core_type = #tpu.core_type<tc>, window_params = [{}, {transform_indices = @transform_1, window_bounds = array<i64: 8, 128>}]} {
    %c0_i32 = arith.constant 0 : i32
    %0 = arith.cmpi eq, %arg0, %c0_i32 : i32
    %1 = arith.extui %0 : i1 to i32
    %c0_i32_0 = arith.constant 0 : i32
    %2 = arith.cmpi ne, %1, %c0_i32_0 : i32
    scf.if %2 {
      "tpu.region"() ({
        %51 = tpu.sem_alloc : memref<!tpu.dma_semaphore, #tpu.memory_space<semaphore_mem>>
        tpu.enqueue_dma source(%arg2 : memref<38x128xf32, #tpu.memory_space<any>>) target(%arg4 : memref<38x128xf32, #tpu.memory_space<vmem>>) target_semaphore(%51 : memref<!tpu.dma_semaphore, #tpu.memory_space<semaphore_mem>>)
        tpu.wait_dma2 semaphore(%51 : memref<!tpu.dma_semaphore, #tpu.memory_space<semaphore_mem>>) src(%arg2 : memref<38x128xf32, #tpu.memory_space<any>>) dst(%arg4 : memref<38x128xf32, #tpu.memory_space<vmem>>)
        tpu.yield
      }) : () -> ()
    } else {
    }
    %c8_i32 = arith.constant 8 : i32
    %3 = arith.muli %arg0, %c8_i32 : i32
    %c0_i32_1 = arith.constant 0 : i32
    %c8_i32_2 = arith.constant 8 : i32
    %4 = arith.muli %c0_i32_1, %c8_i32_2 : i32
    %5 = arith.addi %3, %4 : i32
    %c0_i32_3 = arith.constant 0 : i32
    %6 = arith.addi %5, %c0_i32_3 : i32
    %7 = arith.index_cast %6 : i32 to index
    %8 = memref.load %arg1[%7] : memref<8xi32, #tpu.memory_space<smem>>
    %9 = arith.index_cast %8 : i32 to index
    %c0 = arith.constant 0 : index
    %10 = vector.load %arg4[%9, %c0] : memref<38x128xf32, #tpu.memory_space<vmem>>, vector<1x128xf32>
    %c1_i32 = arith.constant 1 : i32
    %11 = arith.addi %5, %c1_i32 : i32
    %12 = arith.index_cast %11 : i32 to index
    %13 = memref.load %arg1[%12] : memref<8xi32, #tpu.memory_space<smem>>
    %14 = arith.index_cast %13 : i32 to index
    %c0_4 = arith.constant 0 : index
    %15 = vector.load %arg4[%14, %c0_4] : memref<38x128xf32, #tpu.memory_space<vmem>>, vector<1x128xf32>
    %c2_i32 = arith.constant 2 : i32
    %16 = arith.addi %5, %c2_i32 : i32
    %17 = arith.index_cast %16 : i32 to index
    %18 = memref.load %arg1[%17] : memref<8xi32, #tpu.memory_space<smem>>
    %19 = arith.index_cast %18 : i32 to index
    %c0_5 = arith.constant 0 : index
    %20 = vector.load %arg4[%19, %c0_5] : memref<38x128xf32, #tpu.memory_space<vmem>>, vector<1x128xf32>
    %c3_i32 = arith.constant 3 : i32
    %21 = arith.addi %5, %c3_i32 : i32
    %22 = arith.index_cast %21 : i32 to index
    %23 = memref.load %arg1[%22] : memref<8xi32, #tpu.memory_space<smem>>
    %24 = arith.index_cast %23 : i32 to index
    %c0_6 = arith.constant 0 : index
    %25 = vector.load %arg4[%24, %c0_6] : memref<38x128xf32, #tpu.memory_space<vmem>>, vector<1x128xf32>
    %c4_i32 = arith.constant 4 : i32
    %26 = arith.addi %5, %c4_i32 : i32
    %27 = arith.index_cast %26 : i32 to index
    %28 = memref.load %arg1[%27] : memref<8xi32, #tpu.memory_space<smem>>
    %29 = arith.index_cast %28 : i32 to index
    %c0_7 = arith.constant 0 : index
    %30 = vector.load %arg4[%29, %c0_7] : memref<38x128xf32, #tpu.memory_space<vmem>>, vector<1x128xf32>
    %c5_i32 = arith.constant 5 : i32
    %31 = arith.addi %5, %c5_i32 : i32
    %32 = arith.index_cast %31 : i32 to index
    %33 = memref.load %arg1[%32] : memref<8xi32, #tpu.memory_space<smem>>
    %34 = arith.index_cast %33 : i32 to index
    %c0_8 = arith.constant 0 : index
    %35 = vector.load %arg4[%34, %c0_8] : memref<38x128xf32, #tpu.memory_space<vmem>>, vector<1x128xf32>
    %c6_i32 = arith.constant 6 : i32
    %36 = arith.addi %5, %c6_i32 : i32
    %37 = arith.index_cast %36 : i32 to index
    %38 = memref.load %arg1[%37] : memref<8xi32, #tpu.memory_space<smem>>
    %39 = arith.index_cast %38 : i32 to index
    %c0_9 = arith.constant 0 : index
    %40 = vector.load %arg4[%39, %c0_9] : memref<38x128xf32, #tpu.memory_space<vmem>>, vector<1x128xf32>
    %c7_i32 = arith.constant 7 : i32
    %41 = arith.addi %5, %c7_i32 : i32
    %42 = arith.index_cast %41 : i32 to index
    %43 = memref.load %arg1[%42] : memref<8xi32, #tpu.memory_space<smem>>
    %44 = arith.index_cast %43 : i32 to index
    %c0_10 = arith.constant 0 : index
    %45 = vector.load %arg4[%44, %c0_10] : memref<38x128xf32, #tpu.memory_space<vmem>>, vector<1x128xf32>
    %46 = tpu.concatenate %10, %15, %20, %25, %30, %35, %40, %45 in 0 : vector<1x128xf32>, vector<1x128xf32>, vector<1x128xf32>, vector<1x128xf32>, vector<1x128xf32>, vector<1x128xf32>, vector<1x128xf32>, vector<1x128xf32> -> vector<8x128xf32>
    %c8_i32_11 = arith.constant 8 : i32
    %47 = arith.muli %c0_i32_1, %c8_i32_11 : i32
    %48 = tpu.assume_multiple %47, 8 : i32
    %49 = arith.index_cast %48 : i32 to index
    %c0_12 = arith.constant 0 : index
    %50 = vector.load %arg3[%49, %c0_12] : memref<8x128xf32, #tpu.memory_space<vmem>>, vector<8x128xf32>
    tpu.vector_store %arg3[%49, %c0_12], %46 {strides = array<i32>} : memref<8x128xf32, #tpu.memory_space<vmem>>, vector<8x128xf32>,
    %c1_i32_13 = arith.constant 1 : i32
    return
  }
  func.func @transform_1(%arg0: i32, %arg1: memref<8xi32, #tpu.memory_space<smem>>) -> (i32, i32) {
    %c0_i32 = arith.constant 0 : i32
    %c0_i32_0 = arith.constant 0 : i32
    return %arg0, %c0_i32 : i32, i32
  }
}

</mosaic_0001>

<bundles_post_ra>
// kernel: tpu_custom_call.1
= control target key start
LH: loop header
LB: loop body
LE: loop exit
PB: predicated region body
PF: predicated region fallthrough
CT: control target
= control target key end

     0   :  { %s204_s12 = smov [#allocation4]   ;;  %s236_s0 = inlined_call_operand.hbm [shape: s32[8], index: 0, kind: input, shape index: {}]   ;;  %s237_s1 = inlined_call_operand.hbm [shape: f32[38,128], index: 1, kind: input, shape index: {}]   ;;  %s238_s2 = inlined_call_operand.hbm [shape: f32[8,128], index: 2, kind: output, shape index: {}]  }
   0x1   :  { %s8_s11 = sshll.u32 %s236_s0, 4  ;;  %s9_s11 = int_to_ptr.hbm [resolvable:$true] %s8_s11 }
   0x2   :  { %11 = dma.hbm_to_smem %s9_s11, 16, %s204_s12, [#allocation3] }
   0x3   :  { %198 = dma.done.wait [#allocation3], 16 }
   0x4   :  { %199 = vsyncadd [#allocation3], 4294967280 }
   0x5   :  { %14 = sfence }
   0x6   :  { %15 = vsyncpa [#allocation6], 0 }
   0x7   :  { %s27_s15 = sshll.u32 %s237_s1, 4  ;;  %s205_s16 = smov [#allocation2]   ;;  %s28_s15 = int_to_ptr.hbm [resolvable:$true] %s27_s15 }
   0x8   :  { %s29_s17 = sshll.u32 %s205_s16, 4  ;;  %s30_s17 = int_to_ptr.vmem [resolvable:$true] %s29_s17 }
   0x9   :  { %32 = dma.hbm_to_vmem [thread:$0]  %s28_s15, 608, %s30_s17, [#allocation7] }
   0xa   :  { %200 = dma.done.wait [#allocation7], 608 }
   0xb   :  { %201 = vsyncadd [#allocation7], 4294966688  ;;  %s37_s18 = sld [smem:[#allocation4]]  ;;  %vm89_vm0 = vcmask 1040384   ;;  %vm91_vm1 = vcmask 1041408   ;;  %vm93_vm2 = vcmask 1042432  }
   0xc   :  { %s128_s0 = sld [smem:[#allocation4 + $0x1]]  ;;  %vm95_vm3 = vcmask 1043456   ;;  %vm97_vm4 = vcmask 1044480   ;;  %s206_s30 = smov [#allocation5]   ;;  %vm99_vm5 = vcmask 1045504   ;;  %vm101_vm6 = vcmask 1046528  }
   0xd   :  { %s129_s19 = sld [smem:[#allocation4 + $0x2]]  ;;  %s109_s3 = sshll.u32 %s206_s30, 4  ;;  %s110_s3 = int_to_ptr.vmem [resolvable:$true] %s109_s3 }
   0xe   :  { %s130_s20 = sld [smem:[#allocation4 + $0x3]]  ;;  %s111_s7 = sshll.u32 %s238_s2, 4  ;;  %s112_s7 = int_to_ptr.hbm [resolvable:$true] %s111_s7 }
   0xf   :  { %s131_s21 = sld [smem:[#allocation4 + $0x4]] }
  0x10   :  { %s132_s22 = sld [smem:[#allocation4 + $0x5]] }
  0x11   :  { %s133_s23 = sld [smem:[#allocation4 + $0x6]]  ;;  %s38_s25 = scalar_lea.vmem [#allocation2], %s37_s18 }
  0x12   :  { %s228_s24 = sld [smem:[#allocation4 + $0x7]]  ;;  %v39_v0 = vld [vmem:[%s38_s25] sm:$0x1]  ;;  %s42_s26 = scalar_lea.vmem [#allocation2], %s128_s0 }
  0x13   :  { %v43_v1 = vld [vmem:[%s42_s26] sm:$0x1]  ;;  %s46_s1 = scalar_lea.vmem [#allocation2], %s129_s19 }
  0x14   :  { %v47_v2 = vld [vmem:[%s46_s1] sm:$0x1]  ;;  %v69_v3 = vrot.slane %v43_v1, 7  ;;  %s50_s27 = scalar_lea.vmem [#allocation2], %s130_s20 }
  0x15   :  { %v51_v4 = vld [vmem:[%s50_s27] sm:$0x1]  ;;  %v72_v5 = vrot.slane %v47_v2, 6  ;;  %s54_s28 = scalar_lea.vmem [#allocation2], %s131_s21 }
  0x16   :  { %v55_v6 = vld [vmem:[%s54_s28] sm:$0x1]  ;;  %v75_v7 = vrot.slane %v51_v4, 5  ;;  %v90_v8 = vsel %vm89_vm0, %v39_v0, %v69_v3  ;;  %s58_s29 = scalar_lea.vmem [#allocation2], %s132_s22 }
  0x17   :  { %v59_v9 = vld [vmem:[%s58_s29] sm:$0x1]  ;;  %v78_v10 = vrot.slane %v55_v6, 4  ;;  %v92_v11 = vsel %vm91_vm1, %v90_v8, %v72_v5  ;;  %s62_s4 = scalar_lea.vmem [#allocation2], %s133_s23 }
  0x18   :  { %v63_v12 = vld [vmem:[%s62_s4] sm:$0x1]  ;;  %v81_v13 = vrot.slane %v59_v9, 3  ;;  %v94_v14 = vsel %vm93_vm2, %v92_v11, %v75_v7  ;;  %s66_s8 = scalar_lea.vmem [#allocation2], %s228_s24 }
  0x19   :  { %v67_v15 = vld [vmem:[%s66_s8] sm:$0x1]  ;;  %v84_v16 = vrot.slane %v63_v12, 2  ;;  %v96_v17 = vsel %vm95_vm3, %v94_v14, %v78_v10 }
  0x1a   :  { %v87_v18 = vrot.slane %v67_v15, 1  ;;  %v98_v19 = vsel %vm97_vm4, %v96_v17, %v81_v13 }
  0x1b   :  { %v100_v20 = vsel %vm99_vm5, %v98_v19, %v84_v16 }
  0x1c   :  { %v102_v21 = vsel %vm101_vm6, %v100_v20, %v87_v18 }
  0x1d   :  { %103 = vst [vmem:[#allocation5] sm:$0xff] %v102_v21 }
  0x1e   :  { %114 = dma.vmem_to_hbm [thread:$0]  %s110_s3, 128, %s112_s7, [#allocation6]  }
  0x1f   :  { %202 = dma.done.wait [#allocation6], 128  }
  0x20   :  { %203 = vsyncadd [#allocation6], 4294967168 }
  0x21   :  { %119 = vsyncpa [#allocation6], 1 }

</bundles_post_ra>
